<compile_context>
chip_gen: v7x
topology: tpu7x:2x2x1
jax: 0.10.0
libtpu: 0.0.40
codegen_flags: <defaults>
</compile_context>

<pallas_src>
import math

import jax
import jax.numpy as jnp
from jax.experimental import pallas as pl
from jax.experimental.pallas import tpu as pltpu

_GELU_C = math.sqrt(2.0 / math.pi)   # sqrt(2/pi)
_GELU_K = _GELU_C * 0.044715         # folded constant (Horner form)


def _ffn_kernel(x_ref, w1_ref, b1_ref, w2_ref, b2_ref, o_ref, acc_ref):
    # x_ref : (tile_m, E)  bf16     w1_ref: (E, tile_h) bf16   b1_ref: (1, tile_h) f32
    # w2_ref: (tile_h, E)  bf16     b2_ref: (1, E)      f32
    # o_ref : (tile_m, E)  out dtype
    # acc_ref: (tile_m, E) f32 scratch holding fc2 partial sums across tile_h steps
    h_idx = pl.program_id(1)

    @pl.when(h_idx == 0)
    def _init():
        acc_ref[...] = jnp.zeros_like(acc_ref)

    # fc1: bf16 operands on the MXU, f32 accumulate; bias added in f32.
    h = jnp.dot(x_ref[...], w1_ref[...], preferred_element_type=jnp.float32)
    h = h + b1_ref[...]

    # GELU (tanh approximation, Horner form; tanh lowers to the EUP slot).
    # TODO(synk): F.gelu defaults to the exact erf form; tanh approx differs by <~1e-3.
    t = h * h
    g = 0.5 * h + 0.5 * h * jnp.tanh(h * (_GELU_C + _GELU_K * t))

    # fc2 partial product for this hidden chunk, accumulated in f32.
    acc_ref[...] += jnp.dot(g.astype(w2_ref.dtype), w2_ref[...],
                            preferred_element_type=jnp.float32)

    @pl.when(h_idx == pl.num_programs(1) - 1)
    def _finalize():
        o_ref[...] = (acc_ref[...] + b2_ref[...]).astype(o_ref.dtype)


def _round_up(a, b):
    return pl.cdiv(a, b) * b


def _pick_tile_h(H, target=2048):
    """Full H if small, else the largest multiple of 128 dividing H and <= target."""
    if H <= target:
        return H
    c = (target // 128) * 128
    while c >= 128:
        if H % c == 0:
            return c
        c -= 128
    return H  # fallback: keep weights fully resident


def feed_forward(x, w1, b1, w2, b2, *, tile_m=512, tile_h_target=2048):
    """Equivalent of FeedForward.forward in eval mode: fc2(gelu(fc1(x)))."""
    B, S, E = x.shape
    H = w1.shape[1]
    N = B * S
    out_dtype = x.dtype

    # bf16 MXU operands (accumulation stays f32 inside the kernel).
    cdt = jnp.bfloat16
    x2 = x.reshape(N, E).astype(cdt)
    w1c = w1.astype(cdt)
    w2c = w2.astype(cdt)
    b1r = b1.reshape(1, H).astype(jnp.float32)
    b2r = b2.reshape(1, E).astype(jnp.float32)

    # Row-tile sizing: multiple of 8, no host-side padding (ragged last block is
    # masked), and >=2 grid steps when possible so v7x's 2nd TensorCore has work.
    tm = tile_m
    if N < 2 * tile_m:
        tm = max(8, _round_up(pl.cdiv(N, 2), 8))
    tm = min(tm, _round_up(N, 8))
    grid_m = pl.cdiv(N, tm)

    th = _pick_tile_h(H, tile_h_target)
    grid_h = H // th

    # Explicit scoped-VMEM budget: double-buffered tiles + f32 accumulator +
    # in-kernel hidden slabs; clamped to v7x's 64 MiB per-TC physical VMEM.
    vmem_est = (
        2 * tm * E * 2                                   # x tiles (bf16, 2 buffers)
        + 2 * tm * E * jnp.dtype(out_dtype).itemsize     # out tiles
        + 2 * 2 * (E * th) * 2                           # W1 + W2 tiles (bf16, 2 buffers)
        + 2 * (th + E) * 4                               # biases
        + tm * E * 4                                     # accumulator scratch
        + 2 * tm * th * 4                                # fc1 / gelu slabs
    )
    vmem_limit = int(min(max(vmem_est + (8 << 20), 32 << 20), 64 << 20))

    out = pl.pallas_call(
        _ffn_kernel,
        out_shape=jax.ShapeDtypeStruct((N, E), out_dtype),
        grid_spec=pltpu.PrefetchScalarGridSpec(
            num_scalar_prefetch=0,
            grid=(grid_m, grid_h),                        # reduction (H) axis last
            in_specs=[
                pl.BlockSpec((tm, E), lambda i, h: (i, 0)),   # x row tile
                pl.BlockSpec((E, th), lambda i, h: (0, h)),   # W1 column chunk
                pl.BlockSpec((1, th), lambda i, h: (0, h)),   # b1 chunk
                pl.BlockSpec((th, E), lambda i, h: (h, 0)),   # W2 row chunk
                pl.BlockSpec((1, E), lambda i, h: (0, 0)),    # b2
            ],
            out_specs=pl.BlockSpec((tm, E), lambda i, h: (i, 0)),
            scratch_shapes=[pltpu.VMEM((tm, E), jnp.float32)],
        ),
        compiler_params=pltpu.CompilerParams(
            dimension_semantics=("parallel", "arbitrary"),
            vmem_limit_bytes=vmem_limit,
        ),
    )(x2, w1c, b1r, w2c, b2r)

    return out.reshape(B, S, E)


if __name__ == "__main__":
    # Small shapes consistent with the module: batch=2, seq=8, embedding=32.
    embedding_size = 32
    hidden = 4 * embedding_size
    dropout = 0.1  # eval mode -> identity; TODO(synk): training dropout would use pltpu.prng_*
    B, S = 2, 8

    key = jax.random.PRNGKey(0)
    kx, kw1, kb1, kw2, kb2 = jax.random.split(key, 5)

    x = jax.random.normal(kx, (B, S, embedding_size), dtype=jnp.float32)

    # nn.Linear default init: U(-1/sqrt(fan_in), 1/sqrt(fan_in)); weights stored
    # in (in, out) layout (== W.T of the PyTorch parameter).
    lim1 = 1.0 / math.sqrt(embedding_size)
    w1 = jax.random.uniform(kw1, (embedding_size, hidden), minval=-lim1, maxval=lim1,
                            dtype=jnp.float32)
    b1 = jax.random.uniform(kb1, (hidden,), minval=-lim1, maxval=lim1, dtype=jnp.float32)
    lim2 = 1.0 / math.sqrt(hidden)
    w2 = jax.random.uniform(kw2, (hidden, embedding_size), minval=-lim2, maxval=lim2,
                            dtype=jnp.float32)
    b2 = jax.random.uniform(kb2, (embedding_size,), minval=-lim2, maxval=lim2,
                            dtype=jnp.float32)

    out = feed_forward(x, w1, b1, w2, b2)
    out = jax.block_until_ready(out)

    # Pure-JAX f32 reference (same tanh-approx GELU; dropout identity in eval mode).
    def ref_fn(xx):
        h = xx.reshape(-1, embedding_size) @ w1 + b1
        h = 0.5 * h * (1.0 + jnp.tanh(_GELU_C * (h + 0.044715 * h ** 3)))
        y = h @ w2 + b2
        return y.reshape(B, S, embedding_size)

    ref = ref_fn(x)
    assert out.shape == (B, S, embedding_size), out.shape
    assert out.dtype == jnp.float32, out.dtype
    max_err = float(jnp.max(jnp.abs(out - ref)))
    # bf16 MXU operands with f32 accumulation: expect a few 1e-3 abs error vs f32.
    assert jnp.allclose(out, ref, atol=2e-2, rtol=2e-2), f"max abs err {max_err}"

    print("KERNEL_OK")
</pallas_src>

<mosaic_0001>
module attributes {stable_mosaic.version = 11 : i64} {
  func.func @_ffn_kernel(%arg0: i32, %arg1: i32, %arg2: memref<8x32xbf16, #tpu.memory_space<vmem>>, %arg3: memref<32x128xbf16, #tpu.memory_space<vmem>>, %arg4: memref<1x128xf32, #tpu.memory_space<vmem>>, %arg5: memref<128x32xbf16, #tpu.memory_space<vmem>>, %arg6: memref<1x32xf32, #tpu.memory_space<vmem>>, %arg7: memref<8x32xf32, #tpu.memory_space<vmem>>, %arg8: memref<8x32xf32, #tpu.memory_space<vmem>>) attributes {dimension_semantics = [#tpu.dimension_semantics<parallel>, #tpu.dimension_semantics<arbitrary>], iteration_bounds = array<i64: 2, 1>, scalar_prefetch = 0 : i64, scratch_operands = 1 : i64, tpu.core_type = #tpu.core_type<tc>, window_params = [{transform_indices = @transform_0, window_bounds = array<i64: 8, 32>}, {transform_indices = @transform_1, window_bounds = array<i64: 32, 128>}, {transform_indices = @transform_2, window_bounds = array<i64: 1, 128>}, {transform_indices = @transform_3, window_bounds = array<i64: 128, 32>}, {pipeline_mode = #tpu.pipeline_mode<synchronous>, transform_indices = @transform_4, window_bounds = array<i64: 1, 32>}, {transform_indices = @transform_5, window_bounds = array<i64: 8, 32>}]} {
    %c0_i32 = arith.constant 0 : i32
    %0 = arith.cmpi eq, %arg1, %c0_i32 : i32
    %1 = arith.extui %0 : i1 to i32
    %c0_i32_0 = arith.constant 0 : i32
    %2 = arith.cmpi ne, %1, %c0_i32_0 : i32
    scf.if %2 {
      %cst_19 = arith.constant 0.000000e+00 : f32
      %31 = vector.broadcast %cst_19 : f32 to vector<8x32xf32>
      %c0_20 = arith.constant 0 : index
      %c0_21 = arith.constant 0 : index
      %32 = vector.load %arg8[%c0_20, %c0_21] : memref<8x32xf32, #tpu.memory_space<vmem>>, vector<8x32xf32>
      tpu.vector_store %arg8[%c0_20, %c0_21], %31 {strides = array<i32>} : memref<8x32xf32, #tpu.memory_space<vmem>>, vector<8x32xf32>,
    } else {
    }
    %c0 = arith.constant 0 : index
    %c0_1 = arith.constant 0 : index
    %3 = vector.load %arg2[%c0, %c0_1] : memref<8x32xbf16, #tpu.memory_space<vmem>>, vector<8x32xbf16>
    %c0_2 = arith.constant 0 : index
    %c0_3 = arith.constant 0 : index
    %4 = vector.load %arg3[%c0_2, %c0_3] : memref<32x128xbf16, #tpu.memory_space<vmem>>, vector<32x128xbf16>
    %cst = arith.constant dense<0.000000e+00> : vector<8x128xf32>
    %5 = tpu.matmul %3, %4, %cst {dimension_numbers = #tpu.dot_dimension_numbers<[1], [0], [0], [1], [0, 0, 1, 1], [], []>} : vector<8x32xbf16>, vector<32x128xbf16>, vector<8x128xf32> -> vector<8x128xf32>
    %c0_4 = arith.constant 0 : index
    %c0_5 = arith.constant 0 : index
    %6 = vector.load %arg4[%c0_4, %c0_5] : memref<1x128xf32, #tpu.memory_space<vmem>>, vector<1x128xf32>
    %7 = vector.broadcast %6 : vector<1x128xf32> to vector<8x128xf32>
    %8 = arith.addf %5, %7 : vector<8x128xf32>
    %9 = arith.mulf %8, %8 : vector<8x128xf32>
    %cst_6 = arith.constant 5.000000e-01 : f32
    %10 = vector.broadcast %cst_6 : f32 to vector<8x128xf32>
    %11 = arith.mulf %10, %8 : vector<8x128xf32>
    %cst_7 = arith.constant 5.000000e-01 : f32
    %12 = vector.broadcast %cst_7 : f32 to vector<8x128xf32>
    %13 = arith.mulf %12, %8 : vector<8x128xf32>
    %cst_8 = arith.constant 0.0356774069 : f32
    %14 = vector.broadcast %cst_8 : f32 to vector<8x128xf32>
    %15 = arith.mulf %14, %9 : vector<8x128xf32>
    %cst_9 = arith.constant 0.797884583 : f32
    %16 = vector.broadcast %cst_9 : f32 to vector<8x128xf32>
    %17 = arith.addf %16, %15 : vector<8x128xf32>
    %18 = arith.mulf %8, %17 : vector<8x128xf32>
    %19 = math.tanh %18 : vector<8x128xf32>
    %20 = arith.mulf %13, %19 : vector<8x128xf32>
    %21 = arith.addf %11, %20 : vector<8x128xf32>
    %c0_10 = arith.constant 0 : index
    %c0_11 = arith.constant 0 : index
    %22 = vector.load %arg8[%c0_10, %c0_11] : memref<8x32xf32, #tpu.memory_space<vmem>>, vector<8x32xf32>
    %23 = arith.truncf %21 : vector<8x128xf32> to vector<8x128xbf16>
    %c0_12 = arith.constant 0 : index
    %c0_13 = arith.constant 0 : index
    %24 = vector.load %arg5[%c0_12, %c0_13] : memref<128x32xbf16, #tpu.memory_space<vmem>>, vector<128x32xbf16>
    %cst_14 = arith.constant dense<0.000000e+00> : vector<8x32xf32>
    %25 = tpu.matmul %23, %24, %cst_14 {dimension_numbers = #tpu.dot_dimension_numbers<[1], [0], [0], [1], [0, 0, 1, 1], [], []>} : vector<8x128xbf16>, vector<128x32xbf16>, vector<8x32xf32> -> vector<8x32xf32>
    %26 = arith.addf %22, %25 : vector<8x32xf32>
    %c0_15 = arith.constant 0 : index
    %c0_16 = arith.constant 0 : index
    %27 = vector.load %arg8[%c0_15, %c0_16] : memref<8x32xf32, #tpu.memory_space<vmem>>, vector<8x32xf32>
    tpu.vector_store %arg8[%c0_15, %c0_16], %26 {strides = array<i32>} : memref<8x32xf32, #tpu.memory_space<vmem>>, vector<8x32xf32>,
    %c0_i32_17 = arith.constant 0 : i32
    %28 = arith.cmpi eq, %arg1, %c0_i32_17 : i32
    %29 = arith.extui %28 : i1 to i32
    %c0_i32_18 = arith.constant 0 : i32
    %30 = arith.cmpi ne, %29, %c0_i32_18 : i32
    scf.if %30 {
      %c0_19 = arith.constant 0 : index
      %c0_20 = arith.constant 0 : index
      %31 = vector.load %arg8[%c0_19, %c0_20] : memref<8x32xf32, #tpu.memory_space<vmem>>, vector<8x32xf32>
      %c0_21 = arith.constant 0 : index
      %c0_22 = arith.constant 0 : index
      %32 = vector.load %arg6[%c0_21, %c0_22] : memref<1x32xf32, #tpu.memory_space<vmem>>, vector<1x32xf32>
      %33 = vector.broadcast %32 : vector<1x32xf32> to vector<8x32xf32>
      %34 = arith.addf %31, %33 : vector<8x32xf32>
      %c0_23 = arith.constant 0 : index
      %c0_24 = arith.constant 0 : index
      %35 = vector.load %arg7[%c0_23, %c0_24] : memref<8x32xf32, #tpu.memory_space<vmem>>, vector<8x32xf32>
      tpu.vector_store %arg7[%c0_23, %c0_24], %34 {strides = array<i32>} : memref<8x32xf32, #tpu.memory_space<vmem>>, vector<8x32xf32>,
    } else {
    }
    return
  }
  func.func @transform_0(%arg0: i32, %arg1: i32) -> (i32, i32) {
    %c0_i32 = arith.constant 0 : i32
    %c0_i32_0 = arith.constant 0 : i32
    return %arg0, %c0_i32 : i32, i32
  }
  func.func @transform_1(%arg0: i32, %arg1: i32) -> (i32, i32) {
    %c0_i32 = arith.constant 0 : i32
    %c0_i32_0 = arith.constant 0 : i32
    return %c0_i32, %arg1 : i32, i32
  }
  func.func @transform_2(%arg0: i32, %arg1: i32) -> (i32, i32) {
    %c0_i32 = arith.constant 0 : i32
    %c0_i32_0 = arith.constant 0 : i32
    return %c0_i32, %arg1 : i32, i32
  }
  func.func @transform_3(%arg0: i32, %arg1: i32) -> (i32, i32) {
    %c0_i32 = arith.constant 0 : i32
    %c0_i32_0 = arith.constant 0 : i32
    return %arg1, %c0_i32 : i32, i32
  }
  func.func @transform_4(%arg0: i32, %arg1: i32) -> (i32, i32) {
    %c0_i32 = arith.constant 0 : i32
    %c0_i32_0 = arith.constant 0 : i32
    %c0_i32_1 = arith.constant 0 : i32
    return %c0_i32, %c0_i32_0 : i32, i32
  }
  func.func @transform_5(%arg0: i32, %arg1: i32) -> (i32, i32) {
    %c0_i32 = arith.constant 0 : i32
    %c0_i32_0 = arith.constant 0 : i32
    return %arg0, %c0_i32 : i32, i32
  }
}

</mosaic_0001>

<bundles_post_ra>
// kernel: tpu_custom_call.1
= control target key start
LH: loop header
LB: loop body
LE: loop exit
PB: predicated region body
PF: predicated region fallthrough
CT: control target
= control target key end

     0   :  { %10 = vsyncpa [#allocation4], 0  ;;  %s1013_s0 = inlined_call_operand.vmem [shape: bf16[16,32], index: 0, kind: input, shape index: {}]   ;;  %s1014_s1 = inlined_call_operand.vmem [shape: bf16[32,128], index: 1, kind: input, shape index: {}]   ;;  %s1015_s2 = inlined_call_operand.vmem [shape: f32[1,128], index: 2, kind: input, shape index: {}]   ;;  %s1016_s3 = inlined_call_operand.vmem [shape: bf16[128,32], index: 3, kind: input, shape index: {}]   ;;  %s1017_s4 = inlined_call_operand.vmem [shape: f32[1,32], index: 4, kind: input, shape index: {}]   ;;  %s1018_s5 = inlined_call_operand.hbm [shape: f32[16,32], index: 5, kind: output, shape index: {}]  }
   0x1   :  { %12 = vsyncpa [#allocation4 + $0x1], 0  ;;  %s861_s18 = smov 0   ;;  %s863_s19 = smov 0  }
   0x2   :  { %s865_s20 = smov 0   ;;  %s867_s21 = smov 0  }
   0x3   :  { %s869_s22 = smov 0   ;;  %s871_s23 = smov 0  }
   0x4 LB: > { %s612_s24 = sadd.s32 4294967295, %s826_s23   ;;  %s613_s25 = sadd.s32 4294967294, %s826_s23   ;;  %s826_s23 = sphi %s871_s23, %s18_s23   ;;  %s822_s22 = sphi %s869_s22, %s1025_s22   ;;  %s818_s21 = sphi %s867_s21, %s1024_s21   ;;  %s814_s20 = sphi %s865_s20, %s1023_s20   ;;  %s810_s19 = sphi %s863_s19, %s1022_s19   ;;  %s806_s18 = sphi %s861_s18, %s1021_s18  }
   0x5   : > { %s30_s26 = sadd.s32 1, %s822_s22  ;;  %s162_s27 = sadd.s32 1, %s814_s20 }
   0x6   : > { %p32_p0 = scmp.ge.s32.totalorder %s30_s26, 2  ;;  %p172_p1 = scmp.ne.s32.totalorder %s814_s20, %s810_s19 }
   0x7   : > { %p173_p2 = scmp.eq.s32.totalorder %s612_s24, 1  ;;  %p178_p3 = scmp.ne.s32.totalorder %s810_s19, %s806_s18 }
   0x8   : > { %s1027_s26 = smov (%p32_p0, %s30_s26), 0  ;;  %p179_p5 = scmp.eq.s32.totalorder %s613_s25, 1 }
   0x9   : > { %p901_p4 = por %p173_p2, %p172_p1  ;;  %s159_s29 = ssub.s32 %s822_s22, %s1027_s26 }
   0xa   : > { %p619_p6 = scmp.ge.s32.totalorder %s826_s23, 1  ;;  %p160_p7 = scmp.eq.s32.totalorder %s159_s29, 0 }
   0xb   : > { %p908_p8 = por %p179_p5, %p178_p3  ;;  %p229_p9 = scmp.lt.s32.totalorder %s826_s23, 3 }
   0xc   : > { %s914_s6 = scalar_select %p160_p7, %s814_s20, %s162_s27  }
   0xd   : > { %p230_p10 = pnand %p619_p6, %p229_p9 }
   0xe   : > { %v736_v0 = vld [vmem:[%s1014_s1] sm:$0xff] (!%p230_p10)   ;;  %v828_v1 = vmov (!%p230_p10), 0.0   ;;  %v737_v2 = vld [vmem:[%s1014_s1 + $0x8] sm:$0xff] (!%p230_p10)   ;;  %vm829_vm0 = vmmov (!%p230_p10), 0   ;;  %p268_p11 = scmp.lt.s32.totalorder (!%p230_p10), %s818_s21, 1  ;;  %vm290_vm1 = vcmask (!%p230_p10), 261120  }
   0xf   : > { %233 = sbr.rel (%p230_p10) target bundleno = 504 (0x1f8), region = 40  ;;  %651 = vmatprep.subr.bf16.mxu0 (!%p230_p10), %v828_v1  ;;  %659 = vmatprep.subr.bf16.mxu1 (!%p230_p10), %v828_v1  ;;  %291 = vst.msk [vmem:[#allocation2] sm:$0xff] (!%p230_p10), %vm290_vm1, %v828_v1  ;;  %v738_v3 = vld [vmem:[%s1016_s3] sm:$0xff] (!%p230_p10)   ;;  %v739_v5 = vld [vmem:[%s1016_s3 + $0x8] sm:$0xff] (!%p230_p10)   ;;  %v740_v6 = vld [vmem:[%s1016_s3 + $0x10] sm:$0xff] (!%p230_p10)   ;;  %s265_s25 = sand.u32 (!%p230_p10), 1, %s810_s19  }
  0x10   : > { %652 = vmatpush3.bf16.msra.mxu0 (!%p230_p10), %v736_v0  ;;  %655 = vmatprep.mubr.msk.bf16.mxu0 (!%p230_p10), %vm829_vm0, %v828_v1  ;;  %v741_v7 = vld [vmem:[%s1016_s3 + $0x18] sm:$0xff] (!%p230_p10)   ;;  %v742_v8 = vld [vmem:[%s1016_s3 + $0x20] sm:$0xff] (!%p230_p10)   ;;  %v743_v9 = vld [vmem:[%s1016_s3 + $0x28] sm:$0xff] (!%p230_p10)   ;;  %s620_s27 = sshll.u32 (!%p230_p10), %s265_s25, 3  ;;  %s636_s8 = sshll.u32 (!%p230_p10), %s818_s21, 7 }
  0x11   : > { %653 = vmatprep.subr.bf16.mxu0 (!%p230_p10), %v828_v1  ;;  %675 = vmatprep.mubr.msk.bf16.mxu1 (!%p230_p10), %vm829_vm0, %v828_v1  ;;  %v744_v10 = vld [vmem:[%s1016_s3 + $0x30] sm:$0xff] (!%p230_p10)   ;;  %v745_v11 = vld [vmem:[%s1016_s3 + $0x38] sm:$0xff] (!%p230_p10)   ;;  %v622_v12 = vld [vmem:[%s1015_s2] ss:$0 sm:$0xff] (!%p230_p10)  ;;  %s267_s9 = scalar_lea.vmem (!%p230_p10), [#allocation3], %s620_s27 }
  0x12   : > { %660 = vmatpush3.bf16.msra.mxu1 (!%p230_p10), %v738_v3  ;;  %v634_v33 = vld [vmem:[%s1017_s4] ss:$0 sm:$0xff] (!%p230_p10)  ;;  %s503_s10 = sshll.u32 (!%p230_p10), %s267_s9, 4  ;;  %s967_s10 = int_to_ptr.vmem [resolvable:$true] %s503_s10 }
  0x13   : > { %661 = vmatprep.subr.bf16.mxu1 (!%p230_p10), %v828_v1  ;;  %s748_s15 = scalar_lea.vmem (!%p230_p10), %s967_s10, 128 }
  0x14   : > { %654 = vmatpush3.bf16.msra.mxu0 (!%p230_p10), %v737_v2  ;;  %p749_p12 = scmp.ne.s32.totalorder (!%p230_p10), %s967_s10, %s748_s15 }
  0x16   : > { %s269_s13 = scalar_select %p268_p11, %s818_s21, 1  ;;  %662 = vmatpush3.bf16.msra.mxu1 %v739_v5  ;;  %v368_v27 = vld [vmem:[#allocation2] sm:$0xff] }
  0x17   : > { %663 = vmatprep.subr.bf16.mxu1 %v828_v1  ;;  %p750_p13 = pnand %p749_p12, %p901_p4  ;;  %s830_s21 = smov [#allocation3]  }
  0x18   : > { %s621_s14 = sshll.u32 %s269_s13, 2  ;;  %s965_s13 = scalar_lea.hbm %s1018_s5, %s636_s8 }
  0x19   : > { %s271_s17 = scalar_lea.vmem %s1013_s0, %s621_s14  ;;  %s490_s14 = scalar_lea.sflag [#allocation4], %s265_s25 }
  0x1a   : > { %v292_v4 = vld [vmem:[%s271_s17] sm:$0xf]  ;;  %664 = vmatpush3.bf16.msra.mxu1 %v740_v6  ;;  %p751_p0 = pneg %p750_p13  ;;  %s752_s16 = sshll.u32 %s830_s21, 4  ;;  %s753_s16 = int_to_ptr.vmem [resolvable:$false] %s752_s16 }
  0x1b   : > { %656 = vmatmul.mubr.msk.bf16.vlgmr.msra.gmra.mrb[0].mxu0 %vm290_vm1, %v292_v4  ;;  %665 = vmatprep.subr.bf16.mxu1 %v828_v1  ;;  %s754_s17 = scalar_lea.vmem %s753_s16, 256  ;;  %p755_p1 = scmp.lt.s32.totalorder %s967_s10, %s753_s16 }
  0x1c   : > { %p756_p2 = scmp.lt.s32.totalorder %s754_s17, %s748_s15 }
  0x1e   : > { %666 = vmatpush3.bf16.msra.mxu1 %v741_v7  ;;  %p757_p3 = por %p756_p2, %p755_p1 }
  0x1f   : > { %667 = vmatprep.subr.bf16.mxu1 %v828_v1 }
  0x20   : > { %p758_p5 = pnand %p757_p3, %p751_p0 }
  0x22   : > { %668 = vmatpush3.bf16.msra.mxu1 %v742_v8 }
  0x23   : > { %669 = vmatprep.subr.bf16.mxu1 %v828_v1 }
  0x26   : > { %670 = vmatpush3.bf16.msra.mxu1 %v743_v9 }
  0x27   : > { %671 = vmatprep.subr.bf16.mxu1 %v828_v1 }
  0x2a   : > { %672 = vmatpush3.bf16.msra.mxu1 %v744_v10 }
  0x2b   : > { %673 = vmatprep.subr.bf16.mxu1 %v828_v1 }
  0x2e   : > { %674 = vmatpush3.bf16.msra.mxu1 %v745_v11 }
  0xee   : > { %v354_v13 = vpop.f32.mrb[0].mxu0 }
  0xef   : > { %v355_v14 = vadd.f32 %v622_v12, %v354_v13  ;;  %v657_v15 = vpop.f32.mrb[1].mxu0 }
  0xf0   : > { %v357_v16 = vpop.f32.mrb[2].mxu0 }
  0xf1   : > { %v360_v17 = vmul.f32 %v355_v14, %v355_v14  ;;  %v658_v18 = vpop.f32.mrb[3].mxu0  ;;  %v361_v22 = vmul.f32 0.5, %v355_v14 }
  0xf3   : > { %v362_v19 = vmul.f32 0.035677407, %v360_v17 }
  0xf5   : > { %v363_v20 = vadd.f32 0.7978846, %v362_v19 }
  0xf7   : > { %v364_v21 = vmul.f32 %v363_v20, %v355_v14 }
  0xf9   : > { %746 = vtanh.f32 %v364_v21 }
 0x103   : > { %v747_v23 = vpop.eup %746 }
 0x104   : > { %v366_v24 = vmul.f32 %v747_v23, %v361_v22 }
 0x106   : > { %v367_v25 = vadd.f32 %v366_v24, %v361_v22 }
 0x108   : > { %v369_v26 = vpack.c.bf16 %v367_v25, %v367_v25 }
 0x10a   : > { %676 = vmatmul.mubr.bf16.vlgmr.msra.gmra.mrb[0].mxu1 %v369_v26 }
 0x1dd   : > { %v468_v28 = vpop.f32.mrb[0].mxu1 }
 0x1de   : > { %v474_v29 = vadd.f32 %v468_v28, %v368_v27  ;;  %v677_v30 = vpop.f32.mrb[1].mxu1 }
 0x1df   : > { %v471_v31 = vpop.f32.mrb[2].mxu1 }
 0x1e0   : > { %475 = vst.msk [vmem:[#allocation2] sm:$0xff] %vm290_vm1, %v474_v29  ;;  %v678_v32 = vpop.f32.mrb[3].mxu1 }
 0x1e7   : > { %v479_v34 = vld [vmem:[#allocation2] sm:$0xff] }
 0x1e8   : > { %v487_v35 = vadd.f32 %v634_v33, %v479_v34 }
 0x1ea   : > { %488 = vst.msk [vmem:[%s267_s9] sm:$0xff] %vm290_vm1, %v487_v35 }
 0x1eb   : > { %761 = shalt.err (!%p758_p5)
}
 0x1ec   : > { %s762_s24 = scalar_lea.hbm %s965_s13, 128  ;;  %s766_s29 = scalar_lea.hbm %s1018_s5, 256 }
 0x1ed   : > { %p763_p6 = scmp.ne.s32.totalorder %s965_s13, %s762_s24  ;;  %p767_p10 = scmp.lt.u32.totalorder %s965_s13, %s1018_s5 }
 0x1ee   : > { %p768_p11 = scmp.lt.u32.totalorder %s766_s29, %s762_s24  ;;  %p770_p13 = scmp.lt.u32.totalorder %s762_s24, %s965_s13 }
 0x1ef   : > { %p764_p7 = pnand %p763_p6, %p901_p4 }
 0x1f0   : > { %p769_p12 = por %p768_p11, %p767_p10 }
 0x1f1   : > { %p765_p9 = pneg %p764_p7 }
 0x1f2   : > { %p771_p0 = por %p770_p13, %p769_p12 }
 0x1f4   : > { %p772_p1 = pnand %p771_p0, %p765_p9 }
 0x1f6   : > { %775 = shalt.err (!%p772_p1)
}
 0x1f7   : > { %679 = dma.vmem_to_hbm [thread:$0]  (%p901_p4), %s967_s10, 128, %s965_s13, %s490_s14  }
 0x1f8 PF: > { %p685_p2 = scmp.ge.s32.totalorder %s826_s23, 2  ;;  %s515_s9 = sand.u32 1, %s806_s18  }
 0x1f9   : > { %s516_s11 = scalar_lea.sflag [#allocation4], %s515_s9 }
 0x1fa   : > { %p682_p3 = pnand %p685_p2, %p908_p8 }
 0x1fc   : > { %801 = dma.done.wait (!%p682_p3), %s516_s11, 128  }
 0x1fd   : > { %803 = vsyncadd (!%p682_p3), %s516_s11, 4294967168  ;;  %s18_s23 = sadd.s32 1, %s826_s23   ;;  %s1021_s18 = smov %s810_s19 }
 0x1fe   : > { %p15_p5 = scmp.ge.s32.totalorder %s18_s23, 4   ;;  %s1022_s19 = smov %s814_s20 }
 0x1ff   : > { %s1023_s20 = smov %s914_s6  ;;  %s1024_s21 = smov %s822_s22 }
 0x200   : > { %s1025_s22 = smov %s1027_s26  ;;  %17 = sbr.rel (!%p15_p5) target bundleno = 4 (0x4), region = 92 }
 0x207   :  { %521 = vsyncpa [#allocation4], 1 }
 0x208   :  { %523 = vsyncpa [#allocation4 + $0x1], 1 }

</bundles_post_ra>
